<compile_context>
chip_gen: v7x
topology: tpu7x:2x2x1
jax: 0.10.0
libtpu: 0.0.40
codegen_flags: <defaults>
</compile_context>

<pallas_src>
import functools

import jax
import jax.numpy as jnp
from jax.experimental import pallas as pl
from jax.experimental.pallas import tpu as pltpu

_LANE = 128
_SUBLANE = 8
_VMEM_TILE_BUDGET = 20 * 1024 * 1024   # per-step working set target (bytes)
_VMEM_LIMIT = 48 * 1024 * 1024         # scoped limit; fits v7x's 64 MiB VMEM


def _round_up(x, m):
    return ((x + m - 1) // m) * m


def _pick_block_m(m, per_row_bytes, fixed_bytes, cap=1024):
    """Largest M-tile (multiple of 8, <= cap) fitting the VMEM budget."""
    avail = _VMEM_TILE_BUDGET - fixed_bytes
    bm = avail // per_row_bytes if avail > 0 else _SUBLANE
    bm = int(max(_SUBLANE, min(cap, bm)))
    bm = (bm // _SUBLANE) * _SUBLANE
    return min(bm, _round_up(m, _SUBLANE))


# ----------------------------------------------------------------------------
# Pallas kernels
# ----------------------------------------------------------------------------
def _linear_kernel(x_ref, w_ref, b_ref, o_ref, *, relu):
    # bf16 MXU matmul, f32 accumulation / bias / ReLU.
    y = jnp.dot(x_ref[...].astype(jnp.bfloat16), w_ref[...],
                preferred_element_type=jnp.float32)
    y = y + b_ref[...]
    if relu:
        y = jnp.maximum(y, 0.0)
    o_ref[...] = y.astype(o_ref.dtype)


def _mlp_head_kernel(x_ref, w1_ref, b1_ref, w2_ref, b2_ref, o_ref):
    # Fused fc1 (+ReLU) and fc2: the (block_m, 512) fc1 activation never
    # leaves VMEM.
    h = jnp.dot(x_ref[...].astype(jnp.bfloat16), w1_ref[...],
                preferred_element_type=jnp.float32)
    h = jnp.maximum(h + b1_ref[...], 0.0)
    y = jnp.dot(h.astype(jnp.bfloat16), w2_ref[...],
                preferred_element_type=jnp.float32)
    o_ref[...] = (y + b2_ref[...]).astype(o_ref.dtype)


# ----------------------------------------------------------------------------
# Wrappers: M-tiled pallas_calls
# ----------------------------------------------------------------------------
def linear_pallas(x, w_bf16, b_row, *, relu):
    """[relu](x @ w + b); x f32 (M, K), w bf16 (K, Npad), b f32 (1, Npad)."""
    M, K = x.shape
    K2, Np = w_bf16.shape
    assert K2 == K and Np % _LANE == 0 and b_row.shape == (1, Np)

    per_row = 2 * (K * 4 + Np * 4)             # double-buffered x + out tiles
    fixed = 2 * (K * Np * 2 + Np * 4)          # double-buffered bf16 w + f32 b
    block_m = _pick_block_m(M, per_row, fixed)
    Mp = _round_up(M, block_m)
    if Mp != M:
        x = jnp.pad(x, ((0, Mp - M), (0, 0)))
    grid_m = Mp // block_m

    out = pl.pallas_call(
        functools.partial(_linear_kernel, relu=relu),
        out_shape=jax.ShapeDtypeStruct((Mp, Np), jnp.float32),
        grid=(grid_m,),
        in_specs=[
            pl.BlockSpec((block_m, K), lambda i: (i, 0)),
            pl.BlockSpec((K, Np), lambda i: (0, 0)),
            pl.BlockSpec((1, Np), lambda i: (0, 0)),
        ],
        out_specs=pl.BlockSpec((block_m, Np), lambda i: (i, 0)),
        compiler_params=pltpu.CompilerParams(
            dimension_semantics=("parallel",),
            vmem_limit_bytes=_VMEM_LIMIT,
        ),
        cost_estimate=pl.CostEstimate(
            flops=2 * Mp * K * Np,
            transcendentals=0,
            bytes_accessed=Mp * K * 4 + K * Np * 2 + Np * 4 + Mp * Np * 4,
        ),
    )(x, w_bf16, b_row)
    return out[:M] if Mp != M else out


def mlp_head_pallas(x, w1_bf16, b1_row, w2_bf16, b2_row):
    """relu(x @ w1 + b1) @ w2 + b2, fused into one Pallas kernel."""
    M, K = x.shape
    K1, H = w1_bf16.shape
    H2, Np = w2_bf16.shape
    assert K1 == K and H2 == H and Np % _LANE == 0

    per_row = 2 * (K * 4 + Np * 4) + H * 4     # x/out tiles (x2) + fc1 temp
    fixed = 2 * (K * H * 2 + H * 4 + H * Np * 2 + Np * 4)
    block_m = _pick_block_m(M, per_row, fixed)
    Mp = _round_up(M, block_m)
    if Mp != M:
        x = jnp.pad(x, ((0, Mp - M), (0, 0)))
    grid_m = Mp // block_m

    out = pl.pallas_call(
        _mlp_head_kernel,
        out_shape=jax.ShapeDtypeStruct((Mp, Np), jnp.float32),
        grid=(grid_m,),
        in_specs=[
            pl.BlockSpec((block_m, K), lambda i: (i, 0)),
            pl.BlockSpec((K, H), lambda i: (0, 0)),
            pl.BlockSpec((1, H), lambda i: (0, 0)),
            pl.BlockSpec((H, Np), lambda i: (0, 0)),
            pl.BlockSpec((1, Np), lambda i: (0, 0)),
        ],
        out_specs=pl.BlockSpec((block_m, Np), lambda i: (i, 0)),
        compiler_params=pltpu.CompilerParams(
            dimension_semantics=("parallel",),
            vmem_limit_bytes=_VMEM_LIMIT,
        ),
        cost_estimate=pl.CostEstimate(
            flops=2 * Mp * K * H + 2 * Mp * H * Np,
            transcendentals=0,
            bytes_accessed=(Mp * K * 4 + K * H * 2 + H * Np * 2
                            + (H + Np) * 4 + Mp * Np * 4),
        ),
    )(x, w1_bf16, b1_row, w2_bf16, b2_row)
    return out[:M] if Mp != M else out


# ----------------------------------------------------------------------------
# Conv layer: fused XLA patch extraction + Pallas matmul
# ----------------------------------------------------------------------------
def _conv2d_relu(x_nhwc, w_mat, b_row, *, cout, k, stride):
    """nn.Conv2d (valid padding) + ReLU; the matmul runs in the Pallas kernel.

    conv_general_dilated_patches orders the patch features (cin, kh, kw) with
    cin slowest, which matches w_oihw.reshape(Cout, -1).T used in prepare_params.
    """
    n = x_nhwc.shape[0]
    patches = jax.lax.conv_general_dilated_patches(
        x_nhwc, filter_shape=(k, k), window_strides=(stride, stride),
        padding="VALID", dimension_numbers=("NHWC", "HWIO", "NHWC"))
    _, ho, wo, kk = patches.shape
    y = linear_pallas(patches.reshape(n * ho * wo, kk), w_mat, b_row, relu=True)
    return y[:, :cout].reshape(n, ho, wo, cout)   # drop lane padding


# ----------------------------------------------------------------------------
# DQN forward
# ----------------------------------------------------------------------------
def dqn_forward(kparams, x_nchw, *, num_actions):
    x = jnp.transpose(x_nchw, (0, 2, 3, 1))                 # NCHW -> NHWC
    x = _conv2d_relu(x, *kparams["conv1"], cout=32, k=8, stride=4)
    x = _conv2d_relu(x, *kparams["conv2"], cout=64, k=4, stride=2)
    x = _conv2d_relu(x, *kparams["conv3"], cout=64, k=3, stride=1)
    # PyTorch's x.view(N, -1) flattens NCHW order -> transpose back first.
    x = jnp.transpose(x, (0, 3, 1, 2)).reshape(x.shape[0], -1)
    y = mlp_head_pallas(x, *kparams["fc1"], *kparams["fc2"])  # fused fc1+fc2
    return y[:, :num_actions]


# ----------------------------------------------------------------------------
# Parameter prep: PyTorch-layout params -> kernel-ready padded bf16 matrices
# ----------------------------------------------------------------------------
def prepare_params(params):
    def conv_prep(w_oihw, b):
        cout = w_oihw.shape[0]
        npad = _round_up(cout, _LANE)
        w_mat = w_oihw.reshape(cout, -1).T                    # (Cin*kh*kw, Cout)
        w_mat = jnp.pad(w_mat, ((0, 0), (0, npad - cout))).astype(jnp.bfloat16)
        b_row = jnp.pad(b, (0, npad - cout)).reshape(1, npad).astype(jnp.float32)
        return w_mat, b_row

    def fc_prep(w, b):
        cout = w.shape[0]
        npad = _round_up(cout, _LANE)
        w_mat = jnp.pad(w.T, ((0, 0), (0, npad - cout))).astype(jnp.bfloat16)
        b_row = jnp.pad(b, (0, npad - cout)).reshape(1, npad).astype(jnp.float32)
        return w_mat, b_row

    return {
        "conv1": conv_prep(*params["conv1"]),
        "conv2": conv_prep(*params["conv2"]),
        "conv3": conv_prep(*params["conv3"]),
        "fc1": fc_prep(*params["fc1"]),
        "fc2": fc_prep(*params["fc2"]),
    }


# ----------------------------------------------------------------------------
# Deterministic parameter init (PyTorch-default-style uniform, synthetic)
# ----------------------------------------------------------------------------
def _conv_out(h, k, s):
    return (h - k) // s + 1


def init_params(key, input_shape, num_actions):
    C, H, W = input_shape

    def uconv(k, cout, cin, ksz):
        bound = 1.0 / float(cin * ksz * ksz) ** 0.5
        k1, k2 = jax.random.split(k)
        w = jax.random.uniform(k1, (cout, cin, ksz, ksz), jnp.float32, -bound, bound)
        b = jax.random.uniform(k2, (cout,), jnp.float32, -bound, bound)
        return w, b

    def ulin(k, cout, cin):
        bound = 1.0 / float(cin) ** 0.5
        k1, k2 = jax.random.split(k)
        w = jax.random.uniform(k1, (cout, cin), jnp.float32, -bound, bound)
        b = jax.random.uniform(k2, (cout,), jnp.float32, -bound, bound)
        return w, b

    keys = jax.random.split(key, 5)
    conv1 = uconv(keys[0], 32, C, 8)
    conv2 = uconv(keys[1], 64, 32, 4)
    conv3 = uconv(keys[2], 64, 64, 3)
    h = _conv_out(_conv_out(_conv_out(H, 8, 4), 4, 2), 3, 1)
    w = _conv_out(_conv_out(_conv_out(W, 8, 4), 4, 2), 3, 1)
    feat = 64 * h * w                                   # DQN.feature_size()
    fc1 = ulin(keys[3], 512, feat)
    fc2 = ulin(keys[4], num_actions, 512)
    return {"conv1": conv1, "conv2": conv2, "conv3": conv3, "fc1": fc1, "fc2": fc2}


# ----------------------------------------------------------------------------
# Pure-JAX f32 reference (for tolerance check against the bf16 MXU path)
# ----------------------------------------------------------------------------
def dqn_reference(params, x_nchw):
    def conv(x, wb, s):
        w, b = wb
        y = jax.lax.conv_general_dilated(
            x, w, window_strides=(s, s), padding="VALID",
            dimension_numbers=("NCHW", "OIHW", "NCHW"))
        return jax.nn.relu(y + b[None, :, None, None])

    x = conv(x_nchw, params["conv1"], 4)
    x = conv(x, params["conv2"], 2)
    x = conv(x, params["conv3"], 1)
    x = x.reshape(x.shape[0], -1)
    w1, b1 = params["fc1"]
    w2, b2 = params["fc2"]
    x = jax.nn.relu(x @ w1.T + b1)
    return x @ w2.T + b2


if __name__ == "__main__":
    # Smallest spatial size that survives the 8/4 -> 4/2 -> 3/1 conv stack is 36.
    input_shape = (4, 36, 36)
    num_actions = 6
    batch = 2

    key = jax.random.PRNGKey(0)
    kx, kp = jax.random.split(key)
    x = jax.random.normal(kx, (batch,) + input_shape, dtype=jnp.float32)
    params = init_params(kp, input_shape, num_actions)
    kparams = prepare_params(params)

    fwd = jax.jit(functools.partial(dqn_forward, num_actions=num_actions))
    out = jax.block_until_ready(fwd(kparams, x))

    assert out.shape == (batch, num_actions)
    assert out.dtype == jnp.float32
    assert bool(jnp.all(jnp.isfinite(out)))

    # Loose tolerance: kernel uses bf16 MXU operands with f32 accumulation.
    ref = dqn_reference(params, x)
    err = float(jnp.max(jnp.abs(out - ref)))
    scale = 1.0 + float(jnp.max(jnp.abs(ref)))
    assert err <= 0.1 * scale, f"mismatch: max_abs_err={err} scale={scale}"

    print("KERNEL_OK")
</pallas_src>

<mosaic_0001>
module attributes {stable_mosaic.version = 11 : i64} {
  func.func @_linear_kernel(%arg0: i32, %arg1: memref<128x256xf32, #tpu.memory_space<vmem>>, %arg2: memref<256x128xbf16, #tpu.memory_space<vmem>>, %arg3: memref<1x128xf32, #tpu.memory_space<vmem>>, %arg4: memref<128x128xf32, #tpu.memory_space<vmem>>) attributes {dimension_semantics = [#tpu.dimension_semantics<parallel>], iteration_bounds = array<i64: 1>, scalar_prefetch = 0 : i64, scratch_operands = 0 : i64, tpu.core_type = #tpu.core_type<tc>, window_params = [{transform_indices = @transform_0, window_bounds = array<i64: 128, 256>}, {pipeline_mode = #tpu.pipeline_mode<synchronous>, transform_indices = @transform_1, window_bounds = array<i64: 256, 128>}, {pipeline_mode = #tpu.pipeline_mode<synchronous>, transform_indices = @transform_2, window_bounds = array<i64: 1, 128>}, {transform_indices = @transform_3, window_bounds = array<i64: 128, 128>}]} {
    %c0 = arith.constant 0 : index
    %c0_0 = arith.constant 0 : index
    %0 = vector.load %arg1[%c0, %c0_0] : memref<128x256xf32, #tpu.memory_space<vmem>>, vector<128x256xf32>
    %1 = arith.truncf %0 : vector<128x256xf32> to vector<128x256xbf16>
    %c0_1 = arith.constant 0 : index
    %c0_2 = arith.constant 0 : index
    %2 = vector.load %arg2[%c0_1, %c0_2] : memref<256x128xbf16, #tpu.memory_space<vmem>>, vector<256x128xbf16>
    %cst = arith.constant dense<0.000000e+00> : vector<128x128xf32>
    %3 = tpu.matmul %1, %2, %cst {dimension_numbers = #tpu.dot_dimension_numbers<[1], [0], [0], [1], [0, 0, 1, 1], [], []>} : vector<128x256xbf16>, vector<256x128xbf16>, vector<128x128xf32> -> vector<128x128xf32>
    %c0_3 = arith.constant 0 : index
    %c0_4 = arith.constant 0 : index
    %4 = vector.load %arg3[%c0_3, %c0_4] : memref<1x128xf32, #tpu.memory_space<vmem>>, vector<1x128xf32>
    %5 = vector.broadcast %4 : vector<1x128xf32> to vector<128x128xf32>
    %6 = arith.addf %3, %5 : vector<128x128xf32>
    %cst_5 = arith.constant 0.000000e+00 : f32
    %7 = vector.broadcast %cst_5 : f32 to vector<128x128xf32>
    %8 = arith.maximumf %6, %7 : vector<128x128xf32>
    %c0_6 = arith.constant 0 : index
    %c0_7 = arith.constant 0 : index
    %9 = vector.load %arg4[%c0_6, %c0_7] : memref<128x128xf32, #tpu.memory_space<vmem>>, vector<128x128xf32>
    tpu.vector_store %arg4[%c0_6, %c0_7], %8 {strides = array<i32>} : memref<128x128xf32, #tpu.memory_space<vmem>>, vector<128x128xf32>,
    return
  }
  func.func @transform_0(%arg0: i32) -> (i32, i32) {
    %c0_i32 = arith.constant 0 : i32
    %c0_i32_0 = arith.constant 0 : i32
    return %arg0, %c0_i32 : i32, i32
  }
  func.func @transform_1(%arg0: i32) -> (i32, i32) {
    %c0_i32 = arith.constant 0 : i32
    %c0_i32_0 = arith.constant 0 : i32
    %c0_i32_1 = arith.constant 0 : i32
    return %c0_i32, %c0_i32_0 : i32, i32
  }
  func.func @transform_2(%arg0: i32) -> (i32, i32) {
    %c0_i32 = arith.constant 0 : i32
    %c0_i32_0 = arith.constant 0 : i32
    %c0_i32_1 = arith.constant 0 : i32
    return %c0_i32, %c0_i32_0 : i32, i32
  }
  func.func @transform_3(%arg0: i32) -> (i32, i32) {
    %c0_i32 = arith.constant 0 : i32
    %c0_i32_0 = arith.constant 0 : i32
    return %arg0, %c0_i32 : i32, i32
  }
}

module attributes {stable_mosaic.version = 11 : i64} {
  func.func @_linear_kernel(%arg0: i32, %arg1: memref<24x512xf32, #tpu.memory_space<vmem>>, %arg2: memref<512x128xbf16, #tpu.memory_space<vmem>>, %arg3: memref<1x128xf32, #tpu.memory_space<vmem>>, %arg4: memref<24x128xf32, #tpu.memory_space<vmem>>) attributes {dimension_semantics = [#tpu.dimension_semantics<parallel>], iteration_bounds = array<i64: 1>, scalar_prefetch = 0 : i64, scratch_operands = 0 : i64, tpu.core_type = #tpu.core_type<tc>, window_params = [{transform_indices = @transform_0, window_bounds = array<i64: 24, 512>}, {pipeline_mode = #tpu.pipeline_mode<synchronous>, transform_indices = @transform_1, window_bounds = array<i64: 512, 128>}, {pipeline_mode = #tpu.pipeline_mode<synchronous>, transform_indices = @transform_2, window_bounds = array<i64: 1, 128>}, {transform_indices = @transform_3, window_bounds = array<i64: 24, 128>}]} {
    %c0 = arith.constant 0 : index
    %c0_0 = arith.constant 0 : index
    %0 = vector.load %arg1[%c0, %c0_0] : memref<24x512xf32, #tpu.memory_space<vmem>>, vector<24x512xf32>
    %1 = arith.truncf %0 : vector<24x512xf32> to vector<24x512xbf16>
    %c0_1 = arith.constant 0 : index
    %c0_2 = arith.constant 0 : index
    %2 = vector.load %arg2[%c0_1, %c0_2] : memref<512x128xbf16, #tpu.memory_space<vmem>>, vector<512x128xbf16>
    %cst = arith.constant dense<0.000000e+00> : vector<24x128xf32>
    %3 = tpu.matmul %1, %2, %cst {dimension_numbers = #tpu.dot_dimension_numbers<[1], [0], [0], [1], [0, 0, 1, 1], [], []>} : vector<24x512xbf16>, vector<512x128xbf16>, vector<24x128xf32> -> vector<24x128xf32>
    %c0_3 = arith.constant 0 : index
    %c0_4 = arith.constant 0 : index
    %4 = vector.load %arg3[%c0_3, %c0_4] : memref<1x128xf32, #tpu.memory_space<vmem>>, vector<1x128xf32>
    %5 = vector.broadcast %4 : vector<1x128xf32> to vector<24x128xf32>
    %6 = arith.addf %3, %5 : vector<24x128xf32>
    %cst_5 = arith.constant 0.000000e+00 : f32
    %7 = vector.broadcast %cst_5 : f32 to vector<24x128xf32>
    %8 = arith.maximumf %6, %7 : vector<24x128xf32>
    %c0_6 = arith.constant 0 : index
    %c0_7 = arith.constant 0 : index
    %9 = vector.load %arg4[%c0_6, %c0_7] : memref<24x128xf32, #tpu.memory_space<vmem>>, vector<24x128xf32>
    tpu.vector_store %arg4[%c0_6, %c0_7], %8 {strides = array<i32>} : memref<24x128xf32, #tpu.memory_space<vmem>>, vector<24x128xf32>,
    return
  }
  func.func @transform_0(%arg0: i32) -> (i32, i32) {
    %c0_i32 = arith.constant 0 : i32
    %c0_i32_0 = arith.constant 0 : i32
    return %arg0, %c0_i32 : i32, i32
  }
  func.func @transform_1(%arg0: i32) -> (i32, i32) {
    %c0_i32 = arith.constant 0 : i32
    %c0_i32_0 = arith.constant 0 : i32
    %c0_i32_1 = arith.constant 0 : i32
    return %c0_i32, %c0_i32_0 : i32, i32
  }
  func.func @transform_2(%arg0: i32) -> (i32, i32) {
    %c0_i32 = arith.constant 0 : i32
    %c0_i32_0 = arith.constant 0 : i32
    %c0_i32_1 = arith.constant 0 : i32
    return %c0_i32, %c0_i32_0 : i32, i32
  }
  func.func @transform_3(%arg0: i32) -> (i32, i32) {
    %c0_i32 = arith.constant 0 : i32
    %c0_i32_0 = arith.constant 0 : i32
    return %arg0, %c0_i32 : i32, i32
  }
}

module attributes {stable_mosaic.version = 11 : i64} {
  func.func @_linear_kernel(%arg0: i32, %arg1: memref<8x576xf32, #tpu.memory_space<vmem>>, %arg2: memref<576x128xbf16, #tpu.memory_space<vmem>>, %arg3: memref<1x128xf32, #tpu.memory_space<vmem>>, %arg4: memref<8x128xf32, #tpu.memory_space<vmem>>) attributes {dimension_semantics = [#tpu.dimension_semantics<parallel>], iteration_bounds = array<i64: 1>, scalar_prefetch = 0 : i64, scratch_operands = 0 : i64, tpu.core_type = #tpu.core_type<tc>, window_params = [{transform_indices = @transform_0, window_bounds = array<i64: 8, 576>}, {pipeline_mode = #tpu.pipeline_mode<synchronous>, transform_indices = @transform_1, window_bounds = array<i64: 576, 128>}, {pipeline_mode = #tpu.pipeline_mode<synchronous>, transform_indices = @transform_2, window_bounds = array<i64: 1, 128>}, {transform_indices = @transform_3, window_bounds = array<i64: 8, 128>}]} {
    %c0 = arith.constant 0 : index
    %c0_0 = arith.constant 0 : index
    %0 = vector.load %arg1[%c0, %c0_0] : memref<8x576xf32, #tpu.memory_space<vmem>>, vector<8x576xf32>
    %1 = arith.truncf %0 : vector<8x576xf32> to vector<8x576xbf16>
    %c0_1 = arith.constant 0 : index
    %c0_2 = arith.constant 0 : index
    %2 = vector.load %arg2[%c0_1, %c0_2] : memref<576x128xbf16, #tpu.memory_space<vmem>>, vector<576x128xbf16>
    %cst = arith.constant dense<0.000000e+00> : vector<8x128xf32>
    %3 = tpu.matmul %1, %2, %cst {dimension_numbers = #tpu.dot_dimension_numbers<[1], [0], [0], [1], [0, 0, 1, 1], [], []>} : vector<8x576xbf16>, vector<576x128xbf16>, vector<8x128xf32> -> vector<8x128xf32>
    %c0_3 = arith.constant 0 : index
    %c0_4 = arith.constant 0 : index
    %4 = vector.load %arg3[%c0_3, %c0_4] : memref<1x128xf32, #tpu.memory_space<vmem>>, vector<1x128xf32>
    %5 = vector.broadcast %4 : vector<1x128xf32> to vector<8x128xf32>
    %6 = arith.addf %3, %5 : vector<8x128xf32>
    %cst_5 = arith.constant 0.000000e+00 : f32
    %7 = vector.broadcast %cst_5 : f32 to vector<8x128xf32>
    %8 = arith.maximumf %6, %7 : vector<8x128xf32>
    %c0_6 = arith.constant 0 : index
    %c0_7 = arith.constant 0 : index
    %9 = vector.load %arg4[%c0_6, %c0_7] : memref<8x128xf32, #tpu.memory_space<vmem>>, vector<8x128xf32>
    tpu.vector_store %arg4[%c0_6, %c0_7], %8 {strides = array<i32>} : memref<8x128xf32, #tpu.memory_space<vmem>>, vector<8x128xf32>,
    return
  }
  func.func @transform_0(%arg0: i32) -> (i32, i32) {
    %c0_i32 = arith.constant 0 : i32
    %c0_i32_0 = arith.constant 0 : i32
    return %arg0, %c0_i32 : i32, i32
  }
  func.func @transform_1(%arg0: i32) -> (i32, i32) {
    %c0_i32 = arith.constant 0 : i32
    %c0_i32_0 = arith.constant 0 : i32
    %c0_i32_1 = arith.constant 0 : i32
    return %c0_i32, %c0_i32_0 : i32, i32
  }
  func.func @transform_2(%arg0: i32) -> (i32, i32) {
    %c0_i32 = arith.constant 0 : i32
    %c0_i32_0 = arith.constant 0 : i32
    %c0_i32_1 = arith.constant 0 : i32
    return %c0_i32, %c0_i32_0 : i32, i32
  }
  func.func @transform_3(%arg0: i32) -> (i32, i32) {
    %c0_i32 = arith.constant 0 : i32
    %c0_i32_0 = arith.constant 0 : i32
    return %arg0, %c0_i32 : i32, i32
  }
}

module attributes {stable_mosaic.version = 11 : i64} {
  func.func @_mlp_head_kernel(%arg0: i32, %arg1: memref<8x64xf32, #tpu.memory_space<vmem>>, %arg2: memref<64x512xbf16, #tpu.memory_space<vmem>>, %arg3: memref<1x512xf32, #tpu.memory_space<vmem>>, %arg4: memref<512x128xbf16, #tpu.memory_space<vmem>>, %arg5: memref<1x128xf32, #tpu.memory_space<vmem>>, %arg6: memref<8x128xf32, #tpu.memory_space<vmem>>) attributes {dimension_semantics = [#tpu.dimension_semantics<parallel>], iteration_bounds = array<i64: 1>, scalar_prefetch = 0 : i64, scratch_operands = 0 : i64, tpu.core_type = #tpu.core_type<tc>, window_params = [{transform_indices = @transform_0, window_bounds = array<i64: 8, 64>}, {pipeline_mode = #tpu.pipeline_mode<synchronous>, transform_indices = @transform_1, window_bounds = array<i64: 64, 512>}, {pipeline_mode = #tpu.pipeline_mode<synchronous>, transform_indices = @transform_2, window_bounds = array<i64: 1, 512>}, {pipeline_mode = #tpu.pipeline_mode<synchronous>, transform_indices = @transform_3, window_bounds = array<i64: 512, 128>}, {pipeline_mode = #tpu.pipeline_mode<synchronous>, transform_indices = @transform_4, window_bounds = array<i64: 1, 128>}, {transform_indices = @transform_5, window_bounds = array<i64: 8, 128>}]} {
    %c0 = arith.constant 0 : index
    %c0_0 = arith.constant 0 : index
    %0 = vector.load %arg1[%c0, %c0_0] : memref<8x64xf32, #tpu.memory_space<vmem>>, vector<8x64xf32>
    %1 = arith.truncf %0 : vector<8x64xf32> to vector<8x64xbf16>
    %c0_1 = arith.constant 0 : index
    %c0_2 = arith.constant 0 : index
    %2 = vector.load %arg2[%c0_1, %c0_2] : memref<64x512xbf16, #tpu.memory_space<vmem>>, vector<64x512xbf16>
    %cst = arith.constant dense<0.000000e+00> : vector<8x512xf32>
    %3 = tpu.matmul %1, %2, %cst {dimension_numbers = #tpu.dot_dimension_numbers<[1], [0], [0], [1], [0, 0, 1, 1], [], []>} : vector<8x64xbf16>, vector<64x512xbf16>, vector<8x512xf32> -> vector<8x512xf32>
    %c0_3 = arith.constant 0 : index
    %c0_4 = arith.constant 0 : index
    %4 = vector.load %arg3[%c0_3, %c0_4] : memref<1x512xf32, #tpu.memory_space<vmem>>, vector<1x512xf32>
    %5 = vector.broadcast %4 : vector<1x512xf32> to vector<8x512xf32>
    %6 = arith.addf %3, %5 : vector<8x512xf32>
    %cst_5 = arith.constant 0.000000e+00 : f32
    %7 = vector.broadcast %cst_5 : f32 to vector<8x512xf32>
    %8 = arith.maximumf %6, %7 : vector<8x512xf32>
    %9 = arith.truncf %8 : vector<8x512xf32> to vector<8x512xbf16>
    %c0_6 = arith.constant 0 : index
    %c0_7 = arith.constant 0 : index
    %10 = vector.load %arg4[%c0_6, %c0_7] : memref<512x128xbf16, #tpu.memory_space<vmem>>, vector<512x128xbf16>
    %cst_8 = arith.constant dense<0.000000e+00> : vector<8x128xf32>
    %11 = tpu.matmul %9, %10, %cst_8 {dimension_numbers = #tpu.dot_dimension_numbers<[1], [0], [0], [1], [0, 0, 1, 1], [], []>} : vector<8x512xbf16>, vector<512x128xbf16>, vector<8x128xf32> -> vector<8x128xf32>
    %c0_9 = arith.constant 0 : index
    %c0_10 = arith.constant 0 : index
    %12 = vector.load %arg5[%c0_9, %c0_10] : memref<1x128xf32, #tpu.memory_space<vmem>>, vector<1x128xf32>
    %13 = vector.broadcast %12 : vector<1x128xf32> to vector<8x128xf32>
    %14 = arith.addf %11, %13 : vector<8x128xf32>
    %c0_11 = arith.constant 0 : index
    %c0_12 = arith.constant 0 : index
    %15 = vector.load %arg6[%c0_11, %c0_12] : memref<8x128xf32, #tpu.memory_space<vmem>>, vector<8x128xf32>
    tpu.vector_store %arg6[%c0_11, %c0_12], %14 {strides = array<i32>} : memref<8x128xf32, #tpu.memory_space<vmem>>, vector<8x128xf32>,
    return
  }
  func.func @transform_0(%arg0: i32) -> (i32, i32) {
    %c0_i32 = arith.constant 0 : i32
    %c0_i32_0 = arith.constant 0 : i32
    return %arg0, %c0_i32 : i32, i32
  }
  func.func @transform_1(%arg0: i32) -> (i32, i32) {
    %c0_i32 = arith.constant 0 : i32
    %c0_i32_0 = arith.constant 0 : i32
    %c0_i32_1 = arith.constant 0 : i32
    return %c0_i32, %c0_i32_0 : i32, i32
  }
  func.func @transform_2(%arg0: i32) -> (i32, i32) {
    %c0_i32 = arith.constant 0 : i32
    %c0_i32_0 = arith.constant 0 : i32
    %c0_i32_1 = arith.constant 0 : i32
    return %c0_i32, %c0_i32_0 : i32, i32
  }
  func.func @transform_3(%arg0: i32) -> (i32, i32) {
    %c0_i32 = arith.constant 0 : i32
    %c0_i32_0 = arith.constant 0 : i32
    %c0_i32_1 = arith.constant 0 : i32
    return %c0_i32, %c0_i32_0 : i32, i32
  }
  func.func @transform_4(%arg0: i32) -> (i32, i32) {
    %c0_i32 = arith.constant 0 : i32
    %c0_i32_0 = arith.constant 0 : i32
    %c0_i32_1 = arith.constant 0 : i32
    return %c0_i32, %c0_i32_0 : i32, i32
  }
  func.func @transform_5(%arg0: i32) -> (i32, i32) {
    %c0_i32 = arith.constant 0 : i32
    %c0_i32_0 = arith.constant 0 : i32
    return %arg0, %c0_i32 : i32, i32
  }
}

</mosaic_0001>

<bundles_post_ra>
// kernel: dqn_forward.4
= control target key start
LH: loop header
LB: loop body
LE: loop exit
PB: predicated region body
PF: predicated region fallthrough
CT: control target
= control target key end

     0   :  { %s677_s1 = inlined_call_operand.vmem [shape: bf16[256,128], index: 1, kind: input, shape index: {}]   ;;  %s678_s0 = inlined_call_operand.vmem [shape: f32[128,256], index: 0, kind: input, shape index: {}]   ;;  %s679_s2 = inlined_call_operand.vmem [shape: f32[1,128], index: 2, kind: input, shape index: {}]   ;;  %s680_s3 = inlined_call_operand.vmem [shape: f32[128,128], index: 3, kind: output, shape index: {}]  }
   0x1   :  { %v428_v0 = vld [vmem:[%s677_s1 + $0x40] sm:$0xff]   ;;  %v430_v2 = vld [vmem:[%s677_s1 + $0x48] sm:$0xff]   ;;  %v432_v4 = vld [vmem:[%s677_s1 + $0x50] sm:$0xff]  }
   0x2   :  { %v429_v1 = vld [vmem:[%s677_s1] sm:$0xff]   ;;  %348 = vmatprep.subr.bf16.mxu0 %v428_v0  ;;  %412 = vmatprep.subr.bf16.mxu1 %v428_v0  ;;  %v431_v3 = vld [vmem:[%s677_s1 + $0x8] sm:$0xff]   ;;  %v433_v5 = vld [vmem:[%s677_s1 + $0x10] sm:$0xff]  }
   0x3   :  { %349 = vmatpush3.bf16.msra.mxu0 %v429_v1  ;;  %420 = vmatpush3.bf16.msra.mxu1 %v429_v1  ;;  %v434_v6 = vld [vmem:[%s677_s1 + $0x58] sm:$0xff]   ;;  %v436_v8 = vld [vmem:[%s677_s1 + $0x60] sm:$0xff]   ;;  %v438_v10 = vld [vmem:[%s677_s1 + $0x68] sm:$0xff]  }
   0x4   :  { %350 = vmatprep.subr.bf16.mxu0 %v430_v2  ;;  %413 = vmatprep.subr.bf16.mxu1 %v430_v2  ;;  %v435_v7 = vld [vmem:[%s677_s1 + $0x18] sm:$0xff]   ;;  %v437_v9 = vld [vmem:[%s677_s1 + $0x20] sm:$0xff]   ;;  %v16_v11 = vld [vmem:[%s678_s0 + $0x8] sm:$0xff] }
   0x5   :  { %v18_v12 = vld [vmem:[%s678_s0 + $0x18] sm:$0xff]  ;;  %v32_v13 = vld [vmem:[%s678_s0 + $0x88] sm:$0xff]  ;;  %v440_v18 = vld [vmem:[%s677_s1 + $0x70] sm:$0xff]  }
   0x6   :  { %v48_v14 = vpack.c.bf16 %v18_v12, %v16_v11  ;;  %v34_v15 = vld [vmem:[%s678_s0 + $0x98] sm:$0xff]  ;;  %v439_v17 = vld [vmem:[%s677_s1 + $0x28] sm:$0xff]   ;;  %v441_v19 = vld [vmem:[%s677_s1 + $0x30] sm:$0xff]  }
   0x7   :  { %351 = vmatpush3.bf16.msra.mxu0 %v431_v3  ;;  %421 = vmatpush3.bf16.msra.mxu1 %v431_v3  ;;  %v56_v16 = vpack.c.bf16 %v34_v15, %v32_v13  ;;  %v442_v20 = vld [vmem:[%s677_s1 + $0x78] sm:$0xff]   ;;  %v15_v22 = vld [vmem:[%s678_s0] sm:$0xff]  ;;  %v17_v23 = vld [vmem:[%s678_s0 + $0x10] sm:$0xff] }
   0x8   :  { %352 = vmatprep.subr.bf16.mxu0 %v432_v4  ;;  %414 = vmatprep.subr.bf16.mxu1 %v432_v4  ;;  %v443_v21 = vld [vmem:[%s677_s1 + $0x38] sm:$0xff]   ;;  %v31_v24 = vld [vmem:[%s678_s0 + $0x80] sm:$0xff]  ;;  %v33_v25 = vld [vmem:[%s678_s0 + $0x90] sm:$0xff]  ;;  %v47_v30 = vpack.c.bf16 %v17_v23, %v15_v22 }
   0x9   :  { %230 = vmatprep.mubr.bf16.mxu0 %v48_v14  ;;  %262 = vmatprep.mubr.bf16.mxu1 %v56_v16  ;;  %v20_v26 = vld [vmem:[%s678_s0 + $0x28] sm:$0xff]  ;;  %v22_v27 = vld [vmem:[%s678_s0 + $0x38] sm:$0xff]  ;;  %v55_v31 = vpack.c.bf16 %v33_v25, %v31_v24  ;;  %v19_v34 = vld [vmem:[%s678_s0 + $0x20] sm:$0xff] }
   0xa   :  { %v36_v28 = vld [vmem:[%s678_s0 + $0xa8] sm:$0xff]  ;;  %v38_v29 = vld [vmem:[%s678_s0 + $0xb8] sm:$0xff]  ;;  %v50_v32 = vpack.c.bf16 %v22_v27, %v20_v26  ;;  %v21_v35 = vld [vmem:[%s678_s0 + $0x30] sm:$0xff] }
   0xb   :  { %353 = vmatpush3.bf16.msra.mxu0 %v433_v5  ;;  %422 = vmatpush3.bf16.msra.mxu1 %v433_v5  ;;  %v58_v33 = vpack.c.bf16 %v38_v29, %v36_v28  ;;  %v35_v36 = vld [vmem:[%s678_s0 + $0xa0] sm:$0xff]  ;;  %v37_v37 = vld [vmem:[%s678_s0 + $0xb0] sm:$0xff]  ;;  %v24_v38 = vld [vmem:[%s678_s0 + $0x48] sm:$0xff]  ;;  %v49_v42 = vpack.c.bf16 %v21_v35, %v19_v34 }
   0xc   :  { %354 = vmatprep.subr.bf16.mxu0 %v434_v6  ;;  %415 = vmatprep.subr.bf16.mxu1 %v434_v6  ;;  %v26_v39 = vld [vmem:[%s678_s0 + $0x58] sm:$0xff]  ;;  %v40_v40 = vld [vmem:[%s678_s0 + $0xc8] sm:$0xff]  ;;  %v57_v43 = vpack.c.bf16 %v37_v37, %v35_v36  ;;  %v23_v46 = vld [vmem:[%s678_s0 + $0x40] sm:$0xff] }
   0xd   :  { %v42_v41 = vld [vmem:[%s678_s0 + $0xd8] sm:$0xff]  ;;  %v52_v44 = vpack.c.bf16 %v26_v39, %v24_v38  ;;  %v25_v47 = vld [vmem:[%s678_s0 + $0x50] sm:$0xff]  ;;  %v39_v48 = vld [vmem:[%s678_s0 + $0xc0] sm:$0xff] }
   0xe   :  { %v60_v45 = vpack.c.bf16 %v42_v41, %v40_v40  ;;  %v41_v49 = vld [vmem:[%s678_s0 + $0xd0] sm:$0xff]  ;;  %v28_v50 = vld [vmem:[%s678_s0 + $0x68] sm:$0xff]  ;;  %v30_v51 = vld [vmem:[%s678_s0 + $0x78] sm:$0xff]  ;;  %v51_v54 = vpack.c.bf16 %v25_v47, %v23_v46 }
   0xf   :  { %355 = vmatpush3.bf16.msra.mxu0 %v435_v7  ;;  %423 = vmatpush3.bf16.msra.mxu1 %v435_v7  ;;  %v44_v52 = vld [vmem:[%s678_s0 + $0xe8] sm:$0xff]  ;;  %v46_v53 = vld [vmem:[%s678_s0 + $0xf8] sm:$0xff]  ;;  %v59_v55 = vpack.c.bf16 %v41_v49, %v39_v48  ;;  %v54_v56 = vpack.c.bf16 %v30_v51, %v28_v50  ;;  %v27_v58 = vld [vmem:[%s678_s0 + $0x60] sm:$0xff] }
  0x10   :  { %356 = vmatprep.subr.bf16.mxu0 %v436_v8  ;;  %416 = vmatprep.subr.bf16.mxu1 %v436_v8  ;;  %v62_v57 = vpack.c.bf16 %v46_v53, %v44_v52  ;;  %v29_v59 = vld [vmem:[%s678_s0 + $0x70] sm:$0xff]  ;;  %v43_v60 = vld [vmem:[%s678_s0 + $0xe0] sm:$0xff] }
  0x11   :  { %v45_v61 = vld [vmem:[%s678_s0 + $0xf0] sm:$0xff]  ;;  %v53_v62 = vpack.c.bf16 %v29_v59, %v27_v58  ;;  %v611_v2 = vld [vmem:[%s679_s2] ss:$0 sm:$0xff] }
  0x12   :  { %v61_v63 = vpack.c.bf16 %v45_v61, %v43_v60 }
  0x13   :  { %357 = vmatpush3.bf16.msra.mxu0 %v437_v9  ;;  %424 = vmatpush3.bf16.msra.mxu1 %v437_v9 }
  0x14   :  { %358 = vmatprep.subr.bf16.mxu0 %v438_v10  ;;  %417 = vmatprep.subr.bf16.mxu1 %v438_v10 }
  0x17   :  { %359 = vmatpush3.bf16.msra.mxu0 %v439_v17  ;;  %425 = vmatpush3.bf16.msra.mxu1 %v439_v17 }
  0x18   :  { %360 = vmatprep.subr.bf16.mxu0 %v440_v18  ;;  %418 = vmatprep.subr.bf16.mxu1 %v440_v18 }
  0x1b   :  { %361 = vmatpush3.bf16.msra.mxu0 %v441_v19  ;;  %426 = vmatpush3.bf16.msra.mxu1 %v441_v19 }
  0x1c   :  { %362 = vmatprep.subr.bf16.mxu0 %v442_v20  ;;  %419 = vmatprep.subr.bf16.mxu1 %v442_v20 }
  0x1f   :  { %363 = vmatpush3.bf16.msra.mxu0 %v443_v21  ;;  %427 = vmatpush3.bf16.msra.mxu1 %v443_v21 }
  0x22   :  { %231 = vmatmul.mubr.bf16.vlgmr.msra.gmra.mrb[0].mxu0 %v47_v30  ;;  %263 = vmatmul.mubr.bf16.vlgmr.msra.gmra.mrb[0].mxu1 %v55_v31 }
  0x23   :  { %238 = vmatprep.mubr.bf16.mxu0 %v50_v32  ;;  %270 = vmatprep.mubr.bf16.mxu1 %v58_v33 }
  0x2a   :  { %239 = vmatmul.mubr.bf16.gmra.mrb[4].mxu0 %v49_v42  ;;  %271 = vmatmul.mubr.bf16.gmra.mrb[4].mxu1 %v57_v43 }
  0x2b   :  { %246 = vmatprep.mubr.bf16.mxu0 %v52_v44  ;;  %278 = vmatprep.mubr.bf16.mxu1 %v60_v45 }
  0x32   :  { %247 = vmatmul.mubr.bf16.gmra.mrb[8].mxu0 %v51_v54  ;;  %279 = vmatmul.mubr.bf16.gmra.mrb[8].mxu1 %v59_v55 }
  0x33   :  { %254 = vmatprep.mubr.bf16.mxu0 %v54_v56  ;;  %286 = vmatprep.mubr.bf16.mxu1 %v62_v57 }
  0x3a   :  { %255 = vmatmul.mubr.bf16.gmra.mrb[12].mxu0 %v53_v62  ;;  %287 = vmatmul.mubr.bf16.gmra.mrb[12].mxu1 %v61_v63 }
  0xf5   :  { %v364_v0 = vpop.f32.mrb[0].mxu0  ;;  %v388_v1 = vpop.f32.mrb[0].mxu1 }
  0xf6   :  { %v365_v3 = vpop.f32.mrb[1].mxu0  ;;  %v389_v4 = vpop.f32.mrb[1].mxu1 }
  0xf7   :  { %v366_v5 = vadd.f32 %v365_v3, %v364_v0  ;;  %v390_v6 = vadd.f32 %v389_v4, %v388_v1  ;;  %v367_v7 = vpop.f32.mrb[2].mxu0  ;;  %v391_v8 = vpop.f32.mrb[2].mxu1 }
  0xf8   :  { %v368_v9 = vpop.f32.mrb[3].mxu0  ;;  %v392_v10 = vpop.f32.mrb[3].mxu1 }
  0xf9   :  { %v233_v11 = vadd.f32 %v366_v5, %v611_v2  ;;  %v265_v12 = vadd.f32 %v390_v6, %v611_v2  ;;  %v369_v13 = vadd.f32 %v368_v9, %v367_v7  ;;  %v393_v14 = vadd.f32 %v392_v10, %v391_v8 }
  0xfb   :  { %v295_v15 = vmax.f32 %v233_v11, 0.0  ;;  %v303_v16 = vmax.f32 %v265_v12, 0.0  ;;  %v236_v17 = vadd.f32 %v369_v13, %v611_v2  ;;  %v268_v18 = vadd.f32 %v393_v14, %v611_v2 }
  0xfd   :  { %311 = vst [vmem:[%s680_s3] sm:$0xff] %v295_v15  ;;  %319 = vst [vmem:[%s680_s3 + $0x40] sm:$0xff] %v303_v16  ;;  %v296_v19 = vmax.f32 %v236_v17, 0.0  ;;  %v304_v20 = vmax.f32 %v268_v18, 0.0  ;;  %v370_v21 = vpop.f32.mrb[4].mxu0  ;;  %v394_v22 = vpop.f32.mrb[4].mxu1 }
  0xfe   :  { %v371_v23 = vpop.f32.mrb[5].mxu0  ;;  %v395_v24 = vpop.f32.mrb[5].mxu1 }
  0xff   :  { %312 = vst [vmem:[%s680_s3 + $0x8] sm:$0xff] %v296_v19  ;;  %320 = vst [vmem:[%s680_s3 + $0x48] sm:$0xff] %v304_v20  ;;  %v372_v25 = vadd.f32 %v371_v23, %v370_v21  ;;  %v396_v26 = vadd.f32 %v395_v24, %v394_v22  ;;  %v373_v27 = vpop.f32.mrb[6].mxu0  ;;  %v397_v28 = vpop.f32.mrb[6].mxu1 }
 0x100   :  { %v374_v29 = vpop.f32.mrb[7].mxu0  ;;  %v398_v30 = vpop.f32.mrb[7].mxu1 }
 0x101   :  { %v241_v31 = vadd.f32 %v372_v25, %v611_v2  ;;  %v273_v32 = vadd.f32 %v396_v26, %v611_v2  ;;  %v375_v33 = vadd.f32 %v374_v29, %v373_v27  ;;  %v399_v34 = vadd.f32 %v398_v30, %v397_v28 }
 0x103   :  { %v297_v35 = vmax.f32 %v241_v31, 0.0  ;;  %v305_v36 = vmax.f32 %v273_v32, 0.0  ;;  %v244_v37 = vadd.f32 %v375_v33, %v611_v2  ;;  %v276_v38 = vadd.f32 %v399_v34, %v611_v2 }
 0x105   :  { %313 = vst [vmem:[%s680_s3 + $0x10] sm:$0xff] %v297_v35  ;;  %321 = vst [vmem:[%s680_s3 + $0x50] sm:$0xff] %v305_v36  ;;  %v298_v39 = vmax.f32 %v244_v37, 0.0  ;;  %v306_v40 = vmax.f32 %v276_v38, 0.0  ;;  %v376_v41 = vpop.f32.mrb[8].mxu0  ;;  %v400_v42 = vpop.f32.mrb[8].mxu1 }
 0x106   :  { %v377_v43 = vpop.f32.mrb[9].mxu0  ;;  %v401_v44 = vpop.f32.mrb[9].mxu1 }
 0x107   :  { %314 = vst [vmem:[%s680_s3 + $0x18] sm:$0xff] %v298_v39  ;;  %322 = vst [vmem:[%s680_s3 + $0x58] sm:$0xff] %v306_v40  ;;  %v378_v45 = vadd.f32 %v377_v43, %v376_v41  ;;  %v402_v46 = vadd.f32 %v401_v44, %v400_v42  ;;  %v379_v47 = vpop.f32.mrb[10].mxu0  ;;  %v403_v48 = vpop.f32.mrb[10].mxu1 }
 0x108   :  { %v380_v49 = vpop.f32.mrb[11].mxu0  ;;  %v404_v50 = vpop.f32.mrb[11].mxu1 }
 0x109   :  { %v249_v51 = vadd.f32 %v378_v45, %v611_v2  ;;  %v281_v52 = vadd.f32 %v402_v46, %v611_v2  ;;  %v381_v53 = vadd.f32 %v380_v49, %v379_v47  ;;  %v405_v54 = vadd.f32 %v404_v50, %v403_v48 }
 0x10b   :  { %v299_v55 = vmax.f32 %v249_v51, 0.0  ;;  %v307_v56 = vmax.f32 %v281_v52, 0.0  ;;  %v252_v57 = vadd.f32 %v381_v53, %v611_v2  ;;  %v284_v58 = vadd.f32 %v405_v54, %v611_v2 }
 0x10d   :  { %315 = vst [vmem:[%s680_s3 + $0x20] sm:$0xff] %v299_v55  ;;  %323 = vst [vmem:[%s680_s3 + $0x60] sm:$0xff] %v307_v56  ;;  %v300_v59 = vmax.f32 %v252_v57, 0.0  ;;  %v308_v60 = vmax.f32 %v284_v58, 0.0  ;;  %v382_v61 = vpop.f32.mrb[12].mxu0  ;;  %v406_v62 = vpop.f32.mrb[12].mxu1 }
 0x10e   :  { %v383_v63 = vpop.f32.mrb[13].mxu0  ;;  %v407_v0 = vpop.f32.mrb[13].mxu1 }
 0x10f   :  { %316 = vst [vmem:[%s680_s3 + $0x28] sm:$0xff] %v300_v59  ;;  %324 = vst [vmem:[%s680_s3 + $0x68] sm:$0xff] %v308_v60  ;;  %v384_v1 = vadd.f32 %v383_v63, %v382_v61  ;;  %v408_v3 = vadd.f32 %v407_v0, %v406_v62  ;;  %v385_v4 = vpop.f32.mrb[14].mxu0  ;;  %v409_v5 = vpop.f32.mrb[14].mxu1 }
 0x110   :  { %v386_v6 = vpop.f32.mrb[15].mxu0  ;;  %v410_v7 = vpop.f32.mrb[15].mxu1 }
 0x111   :  { %v257_v8 = vadd.f32 %v384_v1, %v611_v2  ;;  %v289_v9 = vadd.f32 %v408_v3, %v611_v2  ;;  %v387_v10 = vadd.f32 %v386_v6, %v385_v4  ;;  %v411_v11 = vadd.f32 %v410_v7, %v409_v5 }
 0x113   :  { %v301_v12 = vmax.f32 %v257_v8, 0.0  ;;  %v309_v13 = vmax.f32 %v289_v9, 0.0  ;;  %v260_v14 = vadd.f32 %v387_v10, %v611_v2  ;;  %v292_v15 = vadd.f32 %v411_v11, %v611_v2 }
 0x115   :  { %317 = vst [vmem:[%s680_s3 + $0x30] sm:$0xff] %v301_v12  ;;  %325 = vst [vmem:[%s680_s3 + $0x70] sm:$0xff] %v309_v13  ;;  %v302_v16 = vmax.f32 %v260_v14, 0.0  ;;  %v310_v17 = vmax.f32 %v292_v15, 0.0 }
 0x117   :  { %318 = vst [vmem:[%s680_s3 + $0x38] sm:$0xff] %v302_v16  ;;  %326 = vst [vmem:[%s680_s3 + $0x78] sm:$0xff] %v310_v17 }

// kernel: dqn_forward.5
= control target key start
LH: loop header
LB: loop body
LE: loop exit
PB: predicated region body
PF: predicated region fallthrough
CT: control target
= control target key end

     0   :  { %s689_s1 = inlined_call_operand.vmem [shape: bf16[512,128], index: 1, kind: input, shape index: {}]   ;;  %s690_s0 = inlined_call_operand.vmem [shape: f32[24,512], index: 0, kind: input, shape index: {}]   ;;  %s691_s2 = inlined_call_operand.vmem [shape: f32[1,128], index: 2, kind: input, shape index: {}]   ;;  %s692_s3 = inlined_call_operand.vmem [shape: f32[24,128], index: 3, kind: output, shape index: {}]  }
   0x1   :  { %v493_v0 = vld [vmem:[%s689_s1 + $0x40] sm:$0xff]   ;;  %v497_v4 = vld [vmem:[%s689_s1 + $0x48] sm:$0xff]   ;;  %v501_v8 = vld [vmem:[%s689_s1 + $0x50] sm:$0xff]  }
   0x2   :  { %v494_v1 = vld [vmem:[%s689_s1 + $0xc0] sm:$0xff]   ;;  %437 = vmatprep.subr.bf16.mxu0 %v493_v0  ;;  %v498_v5 = vld [vmem:[%s689_s1 + $0xc8] sm:$0xff]   ;;  %v502_v9 = vld [vmem:[%s689_s1 + $0xd0] sm:$0xff]  }
   0x3   :  { %v495_v2 = vld [vmem:[%s689_s1] sm:$0xff]   ;;  %465 = vmatprep.subr.bf16.mxu1 %v494_v1  ;;  %v499_v6 = vld [vmem:[%s689_s1 + $0x8] sm:$0xff]   ;;  %v503_v10 = vld [vmem:[%s689_s1 + $0x10] sm:$0xff]  }
   0x4   :  { %v496_v3 = vld [vmem:[%s689_s1 + $0x80] sm:$0xff]   ;;  %438 = vmatpush3.bf16.msra.mxu0 %v495_v2  ;;  %v500_v7 = vld [vmem:[%s689_s1 + $0x88] sm:$0xff]   ;;  %v504_v11 = vld [vmem:[%s689_s1 + $0x90] sm:$0xff]  }
   0x5   :  { %466 = vmatpush3.bf16.msra.mxu1 %v496_v3  ;;  %439 = vmatprep.subr.bf16.mxu0 %v497_v4  ;;  %v505_v12 = vld [vmem:[%s689_s1 + $0x58] sm:$0xff]   ;;  %v509_v16 = vld [vmem:[%s689_s1 + $0x60] sm:$0xff]   ;;  %v513_v20 = vld [vmem:[%s689_s1 + $0x68] sm:$0xff]  }
   0x6   :  { %467 = vmatprep.subr.bf16.mxu1 %v498_v5  ;;  %v506_v13 = vld [vmem:[%s689_s1 + $0xd8] sm:$0xff]   ;;  %v510_v17 = vld [vmem:[%s689_s1 + $0xe0] sm:$0xff]   ;;  %v514_v21 = vld [vmem:[%s689_s1 + $0xe8] sm:$0xff]  }
   0x7   :  { %v507_v14 = vld [vmem:[%s689_s1 + $0x18] sm:$0xff]   ;;  %v511_v18 = vld [vmem:[%s689_s1 + $0x20] sm:$0xff]   ;;  %v515_v22 = vld [vmem:[%s689_s1 + $0x28] sm:$0xff]  }
   0x8   :  { %440 = vmatpush3.bf16.msra.mxu0 %v499_v6  ;;  %v508_v15 = vld [vmem:[%s689_s1 + $0x98] sm:$0xff]   ;;  %v512_v19 = vld [vmem:[%s689_s1 + $0xa0] sm:$0xff]   ;;  %v516_v23 = vld [vmem:[%s689_s1 + $0xa8] sm:$0xff]  }
   0x9   :  { %468 = vmatpush3.bf16.msra.mxu1 %v500_v7  ;;  %441 = vmatprep.subr.bf16.mxu0 %v501_v8  ;;  %v517_v24 = vld [vmem:[%s689_s1 + $0x70] sm:$0xff]   ;;  %v521_v28 = vld [vmem:[%s689_s1 + $0x78] sm:$0xff]   ;;  %v16_v32 = vld [vmem:[%s690_s0 + $0x8] sm:$0xff] }
   0xa   :  { %469 = vmatprep.subr.bf16.mxu1 %v502_v9  ;;  %v518_v25 = vld [vmem:[%s689_s1 + $0xf0] sm:$0xff]   ;;  %v522_v29 = vld [vmem:[%s689_s1 + $0xf8] sm:$0xff]   ;;  %v20_v33 = vld [vmem:[%s690_s0 + $0x28] sm:$0xff] }
   0xb   :  { %v519_v26 = vld [vmem:[%s689_s1 + $0x30] sm:$0xff]   ;;  %v523_v30 = vld [vmem:[%s689_s1 + $0x38] sm:$0xff]   ;;  %v28_v35 = vpack.c.bf16 %v20_v33, %v16_v32  ;;  %v15_v37 = vld [vmem:[%s690_s0] sm:$0xff] }
   0xc   :  { %442 = vmatpush3.bf16.msra.mxu0 %v503_v10  ;;  %v520_v27 = vld [vmem:[%s689_s1 + $0xb0] sm:$0xff]   ;;  %v524_v31 = vld [vmem:[%s689_s1 + $0xb8] sm:$0xff]   ;;  %v19_v38 = vld [vmem:[%s690_s0 + $0x20] sm:$0xff] }
   0xd   :  { %470 = vmatpush3.bf16.msra.mxu1 %v504_v11  ;;  %443 = vmatprep.subr.bf16.mxu0 %v505_v12  ;;  %v18_v34 = vld [vmem:[%s690_s0 + $0x18] sm:$0xff]  ;;  %v27_v40 = vpack.c.bf16 %v19_v38, %v15_v37  ;;  %v17_v41 = vld [vmem:[%s690_s0 + $0x10] sm:$0xff]  ;;  %v24_v43 = vld [vmem:[%s690_s0 + $0x48] sm:$0xff] }
   0xe   :  { %471 = vmatprep.subr.bf16.mxu1 %v506_v13  ;;  %v22_v36 = vld [vmem:[%s690_s0 + $0x38] sm:$0xff]  ;;  %v21_v42 = vld [vmem:[%s690_s0 + $0x30] sm:$0xff]  ;;  %330 = vmatprep.mubr.bf16.mxu0 %v28_v35  ;;  %v32_v45 = vpack.c.bf16 %v24_v43, %v24_v43  ;;  %v23_v48 = vld [vmem:[%s690_s0 + $0x40] sm:$0xff] }
   0xf   :  { %v30_v39 = vpack.c.bf16 %v22_v36, %v18_v34  ;;  %v29_v44 = vpack.c.bf16 %v21_v42, %v17_v41  ;;  %v26_v46 = vld [vmem:[%s690_s0 + $0x58] sm:$0xff]  ;;  %v25_v49 = vld [vmem:[%s690_s0 + $0x50] sm:$0xff]  ;;  %v31_v50 = vpack.c.bf16 %v23_v48, %v23_v48  ;;  %v404_v54 = vld [vmem:[%s691_s2] ss:$0 sm:$0xff] }
  0x10   :  { %444 = vmatpush3.bf16.msra.mxu0 %v507_v14  ;;  %v34_v47 = vpack.c.bf16 %v26_v46, %v26_v46  ;;  %v33_v51 = vpack.c.bf16 %v25_v49, %v25_v49 }
  0x11   :  { %472 = vmatpush3.bf16.msra.mxu1 %v508_v15  ;;  %445 = vmatprep.subr.bf16.mxu0 %v509_v16 }
  0x12   :  { %473 = vmatprep.subr.bf16.mxu1 %v510_v17  ;;  %378 = vmatprep.mubr.bf16.mxu1 %v30_v39 }
  0x14   :  { %446 = vmatpush3.bf16.msra.mxu0 %v511_v18 }
  0x15   :  { %474 = vmatpush3.bf16.msra.mxu1 %v512_v19  ;;  %447 = vmatprep.subr.bf16.mxu0 %v513_v20 }
  0x16   :  { %475 = vmatprep.subr.bf16.mxu1 %v514_v21 }
  0x18   :  { %448 = vmatpush3.bf16.msra.mxu0 %v515_v22 }
  0x19   :  { %476 = vmatpush3.bf16.msra.mxu1 %v516_v23  ;;  %449 = vmatprep.subr.bf16.mxu0 %v517_v24 }
  0x1a   :  { %477 = vmatprep.subr.bf16.mxu1 %v518_v25 }
  0x1c   :  { %450 = vmatpush3.bf16.msra.mxu0 %v519_v26 }
  0x1d   :  { %478 = vmatpush3.bf16.msra.mxu1 %v520_v27  ;;  %451 = vmatprep.subr.bf16.mxu0 %v521_v28 }
  0x1e   :  { %479 = vmatprep.subr.bf16.mxu1 %v522_v29 }
  0x20   :  { %452 = vmatpush3.bf16.msra.mxu0 %v523_v30 }
  0x21   :  { %480 = vmatpush3.bf16.msra.mxu1 %v524_v31 }
  0x23   :  { %331 = vmatmul.mubr.bf16.vlgmr.msra.gmra.mrb[0].mxu0 %v27_v40 }
  0x24   :  { %379 = vmatmul.mubr.bf16.vlgmr.msra.gmra.mrb[0].mxu1 %v29_v44  ;;  %338 = vmatprep.mubr.bf16.mxu0 %v32_v45 }
  0x25   :  { %386 = vmatprep.mubr.bf16.mxu1 %v34_v47 }
  0x2b   :  { %339 = vmatmul.mubr.bf16.gmra.mrb[4].mxu0 %v31_v50 }
  0x2c   :  { %387 = vmatmul.mubr.bf16.gmra.mrb[4].mxu1 %v33_v51 }
  0xf6   :  { %v453_v52 = vpop.f32.mrb[0].mxu0 }
  0xf7   :  { %v481_v53 = vpop.f32.mrb[0].mxu1  ;;  %v454_v55 = vpop.f32.mrb[1].mxu0 }
  0xf8   :  { %v455_v56 = vadd.f32 %v454_v55, %v453_v52  ;;  %v482_v57 = vpop.f32.mrb[1].mxu1  ;;  %v456_v58 = vpop.f32.mrb[2].mxu0 }
  0xf9   :  { %v483_v59 = vadd.f32 %v482_v57, %v481_v53  ;;  %v484_v60 = vpop.f32.mrb[2].mxu1  ;;  %v457_v61 = vpop.f32.mrb[3].mxu0 }
  0xfa   :  { %v333_v62 = vadd.f32 %v455_v56, %v404_v54  ;;  %v458_v63 = vadd.f32 %v457_v61, %v456_v58  ;;  %v485_v0 = vpop.f32.mrb[3].mxu1 }
  0xfb   :  { %v486_v1 = vadd.f32 %v485_v0, %v484_v60 }
  0xfc   :  { %v381_v2 = vadd.f32 %v483_v59, %v333_v62  ;;  %v336_v3 = vadd.f32 %v458_v63, %v404_v54 }
  0xfe   :  { %v394_v4 = vmax.f32 %v381_v2, 0.0  ;;  %v384_v5 = vadd.f32 %v486_v1, %v336_v3  ;;  %v459_v6 = vpop.f32.mrb[4].mxu0 }
  0xff   :  { %v487_v7 = vpop.f32.mrb[4].mxu1  ;;  %v460_v8 = vpop.f32.mrb[5].mxu0 }
 0x100   :  { %397 = vst [vmem:[%s692_s3] sm:$0xff] %v394_v4  ;;  %v395_v9 = vmax.f32 %v384_v5, 0.0  ;;  %v461_v10 = vadd.f32 %v460_v8, %v459_v6  ;;  %v488_v11 = vpop.f32.mrb[5].mxu1  ;;  %v462_v12 = vpop.f32.mrb[6].mxu0 }
 0x101   :  { %v489_v13 = vadd.f32 %v488_v11, %v487_v7  ;;  %v490_v14 = vpop.f32.mrb[6].mxu1  ;;  %v463_v15 = vpop.f32.mrb[7].mxu0 }
 0x102   :  { %398 = vst [vmem:[%s692_s3 + $0x8] sm:$0xff] %v395_v9  ;;  %v341_v16 = vadd.f32 %v461_v10, %v404_v54  ;;  %v491_v17 = vpop.f32.mrb[7].mxu1 }
 0x104   :  { %v389_v18 = vadd.f32 %v489_v13, %v341_v16 }
 0x106   :  { %v396_v19 = vmax.f32 %v389_v18, 0.0 }
 0x108   :  { %399 = vst [vmem:[%s692_s3 + $0x10] sm:$0xff] %v396_v19 }

// kernel: dqn_forward.6
= control target key start
LH: loop header
LB: loop body
LE: loop exit
PB: predicated region body
PF: predicated region fallthrough
CT: control target
= control target key end

     0   :  { %v587_v35 = vmov 0.0   ;;  %vm588_vm0 = vmmov 0   ;;  %vm320_vm1 = vcmask 523264   ;;  %s738_s1 = inlined_call_operand.vmem [shape: bf16[576,128], index: 1, kind: input, shape index: {}]   ;;  %s739_s0 = inlined_call_operand.vmem [shape: f32[8,576], index: 0, kind: input, shape index: {}]   ;;  %s740_s2 = inlined_call_operand.vmem [shape: f32[1,128], index: 2, kind: input, shape index: {}]   ;;  %s741_s3 = inlined_call_operand.vmem [shape: f32[8,128], index: 3, kind: output, shape index: {}]  }
   0x1   :  { %v551_v0 = vld [vmem:[%s738_s1 + $0x40] sm:$0xff]   ;;  %v555_v4 = vld [vmem:[%s738_s1 + $0x48] sm:$0xff]   ;;  %v559_v8 = vld [vmem:[%s738_s1 + $0x50] sm:$0xff]  }
   0x2   :  { %v552_v1 = vld [vmem:[%s738_s1] sm:$0xff]   ;;  %488 = vmatprep.subr.bf16.mxu0 %v551_v0  ;;  %v556_v5 = vld [vmem:[%s738_s1 + $0x8] sm:$0xff]   ;;  %v560_v9 = vld [vmem:[%s738_s1 + $0x10] sm:$0xff]  }
   0x3   :  { %v553_v2 = vld [vmem:[%s738_s1 + $0xc0] sm:$0xff]   ;;  %489 = vmatpush3.bf16.msra.mxu0 %v552_v1  ;;  %v557_v6 = vld [vmem:[%s738_s1 + $0xc8] sm:$0xff]   ;;  %v561_v10 = vld [vmem:[%s738_s1 + $0xd0] sm:$0xff]  }
   0x4   :  { %v554_v3 = vld [vmem:[%s738_s1 + $0x80] sm:$0xff]   ;;  %510 = vmatprep.subr.bf16.mxu1 %v553_v2  ;;  %490 = vmatprep.subr.bf16.mxu0 %v555_v4  ;;  %v558_v7 = vld [vmem:[%s738_s1 + $0x88] sm:$0xff]   ;;  %v562_v11 = vld [vmem:[%s738_s1 + $0x90] sm:$0xff]  }
   0x5   :  { %511 = vmatpush3.bf16.msra.mxu1 %v554_v3  ;;  %v563_v12 = vld [vmem:[%s738_s1 + $0x58] sm:$0xff]   ;;  %v567_v16 = vld [vmem:[%s738_s1 + $0x60] sm:$0xff]   ;;  %v571_v20 = vld [vmem:[%s738_s1 + $0x68] sm:$0xff]  }
   0x6   :  { %512 = vmatprep.subr.bf16.mxu1 %v557_v6  ;;  %v564_v13 = vld [vmem:[%s738_s1 + $0x18] sm:$0xff]   ;;  %v568_v17 = vld [vmem:[%s738_s1 + $0x20] sm:$0xff]   ;;  %v572_v21 = vld [vmem:[%s738_s1 + $0x28] sm:$0xff]  }
   0x7   :  { %491 = vmatpush3.bf16.msra.mxu0 %v556_v5  ;;  %v565_v14 = vld [vmem:[%s738_s1 + $0xd8] sm:$0xff]   ;;  %v569_v18 = vld [vmem:[%s738_s1 + $0xe0] sm:$0xff]   ;;  %v573_v22 = vld [vmem:[%s738_s1 + $0xe8] sm:$0xff]  }
   0x8   :  { %492 = vmatprep.subr.bf16.mxu0 %v559_v8  ;;  %v566_v15 = vld [vmem:[%s738_s1 + $0x98] sm:$0xff]   ;;  %v570_v19 = vld [vmem:[%s738_s1 + $0xa0] sm:$0xff]   ;;  %v574_v23 = vld [vmem:[%s738_s1 + $0xa8] sm:$0xff]  }
   0x9   :  { %513 = vmatpush3.bf16.msra.mxu1 %v558_v7  ;;  %v575_v24 = vld [vmem:[%s738_s1 + $0x70] sm:$0xff]   ;;  %v579_v28 = vld [vmem:[%s738_s1 + $0x78] sm:$0xff]   ;;  %v16_v31 = vld [vmem:[%s739_s0 + $0x8] sm:$0xff] }
   0xa   :  { %514 = vmatprep.subr.bf16.mxu1 %v561_v10  ;;  %v576_v25 = vld [vmem:[%s738_s1 + $0x30] sm:$0xff]   ;;  %v580_v29 = vld [vmem:[%s738_s1 + $0x38] sm:$0xff]   ;;  %v21_v32 = vpack.c.bf16 %v16_v31, %v16_v31  ;;  %v15_v34 = vld [vmem:[%s739_s0] sm:$0xff] }
   0xb   :  { %493 = vmatpush3.bf16.msra.mxu0 %v560_v9  ;;  %v577_v26 = vld [vmem:[%s738_s1 + $0xf0] sm:$0xff]   ;;  %v581_v30 = vld [vmem:[%s738_s1 + $0xf8] sm:$0xff]   ;;  %v20_v37 = vpack.c.bf16 %v15_v34, %v15_v34  ;;  %v583_v39 = vld [vmem:[%s738_s1 + $0x100] sm:$0xff]  }
   0xc   :  { %494 = vmatprep.subr.bf16.mxu0 %v563_v12  ;;  %v578_v27 = vld [vmem:[%s738_s1 + $0xb0] sm:$0xff]   ;;  %v582_v33 = vld [vmem:[%s738_s1 + $0xb8] sm:$0xff]   ;;  %356 = vmatprep.mubr.bf16.mxu0 %v21_v32  ;;  %v584_v42 = vld [vmem:[%s738_s1 + $0x108] sm:$0xff]  }
   0xd   :  { %515 = vmatpush3.bf16.msra.mxu1 %v562_v11  ;;  %v18_v36 = vld [vmem:[%s739_s0 + $0x18] sm:$0xff]  ;;  %v17_v40 = vld [vmem:[%s739_s0 + $0x10] sm:$0xff]  ;;  %v19_v45 = vld [vmem:[%s739_s0 + $0x20] sm:$0xff] }
   0xe   :  { %516 = vmatprep.subr.bf16.mxu1 %v565_v14  ;;  %v23_v38 = vpack.c.bf16 %v18_v36, %v18_v36  ;;  %v22_v41 = vpack.c.bf16 %v17_v40, %v17_v40  ;;  %v585_v43 = vld [vmem:[%s738_s1 + $0x110] sm:$0xff]   ;;  %v586_v44 = vld [vmem:[%s738_s1 + $0x118] sm:$0xff]   ;;  %v24_v46 = vpack.c.bf16 %v19_v45, %v19_v45  ;;  %v450_v48 = vld [vmem:[%s740_s2] ss:$0 sm:$0xff] }
   0xf   :  { %495 = vmatpush3.bf16.msra.mxu0 %v564_v13 }
  0x10   :  { %496 = vmatprep.subr.bf16.mxu0 %v567_v16  ;;  %396 = vmatprep.mubr.bf16.mxu1 %v23_v38 }
  0x11   :  { %517 = vmatpush3.bf16.msra.mxu1 %v566_v15 }
  0x12   :  { %518 = vmatprep.subr.bf16.mxu1 %v569_v18 }
  0x13   :  { %497 = vmatpush3.bf16.msra.mxu0 %v568_v17 }
  0x14   :  { %498 = vmatprep.subr.bf16.mxu0 %v571_v20 }
  0x15   :  { %519 = vmatpush3.bf16.msra.mxu1 %v570_v19 }
  0x16   :  { %520 = vmatprep.subr.bf16.mxu1 %v573_v22 }
  0x17   :  { %499 = vmatpush3.bf16.msra.mxu0 %v572_v21 }
  0x18   :  { %500 = vmatprep.subr.bf16.mxu0 %v575_v24 }
  0x19   :  { %521 = vmatpush3.bf16.msra.mxu1 %v574_v23 }
  0x1a   :  { %522 = vmatprep.subr.bf16.mxu1 %v577_v26 }
  0x1b   :  { %501 = vmatpush3.bf16.msra.mxu0 %v576_v25 }
  0x1c   :  { %502 = vmatprep.subr.bf16.mxu0 %v579_v28 }
  0x1d   :  { %523 = vmatpush3.bf16.msra.mxu1 %v578_v27 }
  0x1e   :  { %524 = vmatprep.subr.bf16.mxu1 %v581_v30 }
  0x1f   :  { %503 = vmatpush3.bf16.msra.mxu0 %v580_v29 }
  0x20   :  { %537 = vmatprep.subr.bf16.mxu0 %v587_v35 }
  0x21   :  { %525 = vmatpush3.bf16.msra.mxu1 %v582_v33 }
  0x22   :  { %357 = vmatmul.mubr.bf16.vlgmr.msra.gmra.mrb[0].mxu0 %v20_v37 }
  0x23   :  { %538 = vmatpush3.bf16.msra.mxu0 %v583_v39  ;;  %545 = vmatprep.mubr.msk.bf16.mxu0 %vm588_vm0, %v587_v35 }
  0x24   :  { %397 = vmatmul.mubr.bf16.vlgmr.msra.gmra.mrb[0].mxu1 %v22_v41  ;;  %539 = vmatprep.subr.bf16.mxu0 %v587_v35 }
  0x27   :  { %540 = vmatpush3.bf16.msra.mxu0 %v584_v42 }
  0x28   :  { %541 = vmatprep.subr.bf16.mxu0 %v587_v35 }
  0x2b   :  { %542 = vmatpush3.bf16.msra.mxu0 %v585_v43 }
  0x2c   :  { %543 = vmatprep.subr.bf16.mxu0 %v587_v35 }
  0x2f   :  { %544 = vmatpush3.bf16.msra.mxu0 %v586_v44 }
  0x32   :  { %546 = vmatmul.mubr.msk.bf16.vlgmr.msra.gmra.mrb[4].mxu0 %vm320_vm1, %v24_v46 }
  0xf5   :  { %v504_v47 = vpop.f32.mrb[0].mxu0 }
  0xf6   :  { %v505_v49 = vpop.f32.mrb[1].mxu0 }
  0xf7   :  { %v506_v50 = vadd.f32 %v505_v49, %v504_v47  ;;  %v507_v51 = vpop.f32.mrb[2].mxu0  ;;  %v526_v52 = vpop.f32.mrb[0].mxu1 }
  0xf8   :  { %v508_v53 = vpop.f32.mrb[3].mxu0  ;;  %v527_v54 = vpop.f32.mrb[1].mxu1 }
  0xf9   :  { %v359_v55 = vadd.f32 %v506_v50, %v450_v48  ;;  %v528_v56 = vadd.f32 %v527_v54, %v526_v52  ;;  %v529_v57 = vpop.f32.mrb[2].mxu1 }
  0xfa   :  { %v530_v58 = vpop.f32.mrb[3].mxu1 }
  0xfb   :  { %v399_v59 = vadd.f32 %v528_v56, %v359_v55 }
 0x105   :  { %v438_v60 = vpop.f32.mrb[4].mxu0 }
 0x106   :  { %v439_v61 = vadd.f32 %v438_v60, %v399_v59  ;;  %v547_v62 = vpop.f32.mrb[5].mxu0 }
 0x107   :  { %v441_v63 = vpop.f32.mrb[6].mxu0 }
 0x108   :  { %v444_v0 = vmax.f32 %v439_v61, 0.0  ;;  %v548_v1 = vpop.f32.mrb[7].mxu0 }
 0x10a   :  { %445 = vst [vmem:[%s741_s3] sm:$0xff] %v444_v0 }

// kernel: dqn_forward.7
= control target key start
LH: loop header
LB: loop body
LE: loop exit
PB: predicated region body
PF: predicated region fallthrough
CT: control target
= control target key end

     0   :  { %v735_v1 = vmov 0   ;;  %vm141_vm0 = vcmask 523264   ;;  %v41_v51 = vlaneseq  ;;  %s922_s1 = inlined_call_operand.vmem [shape: bf16[64,512], index: 1, kind: input, shape index: {}]   ;;  %s923_s0 = inlined_call_operand.vmem [shape: f32[8,64], index: 0, kind: input, shape index: {}]   ;;  %s924_s3 = inlined_call_operand.vmem [shape: bf16[512,128], index: 3, kind: input, shape index: {}]   ;;  %s925_s2 = inlined_call_operand.vmem [shape: f32[1,512], index: 2, kind: input, shape index: {}]   ;;  %s926_s4 = inlined_call_operand.vmem [shape: f32[1,128], index: 4, kind: input, shape index: {}]   ;;  %s927_s5 = inlined_call_operand.vmem [shape: f32[8,128], index: 5, kind: output, shape index: {}]  }
   0x1   :  { %v679_v0 = vld [vmem:[%s922_s1 + $0x4] ss:$16 sps:$4 sm:$0xff]   ;;  %177 = vmatprep.mubr.bf16.mxu0 %v735_v1  ;;  %218 = vmatprep.mubr.bf16.mxu1 %v735_v1  ;;  %v681_v2 = vld [vmem:[%s922_s1 + $0xc] ss:$16 sps:$4 sm:$0xff]   ;;  %v683_v3 = vld [vmem:[%s922_s1] ss:$16 sps:$4 sm:$0xff]  }
   0x2   :  { %145 = vmatprep.subr.bf16.mxu0 %v679_v0  ;;  %v684_v4 = vld [vmem:[%s922_s1 + $0x8] ss:$16 sps:$4 sm:$0xff]   ;;  %186 = vmatprep.subr.bf16.mxu1 %v681_v2  ;;  %v685_v5 = vld [vmem:[%s922_s1 + $0x24] ss:$16 sps:$4 sm:$0xff]   ;;  %v687_v6 = vld [vmem:[%s922_s1 + $0x2c] ss:$16 sps:$4 sm:$0xff]  }
   0x3   :  { %146 = vmatpush1.bf16.msra.mxu0 %v683_v3  ;;  %187 = vmatpush1.bf16.msra.mxu1 %v684_v4  ;;  %v689_v7 = vld [vmem:[%s922_s1 + $0x20] ss:$16 sps:$4 sm:$0xff]   ;;  %v690_v8 = vld [vmem:[%s922_s1 + $0x28] ss:$16 sps:$4 sm:$0xff]   ;;  %v691_v9 = vld [vmem:[%s922_s1 + $0x44] ss:$16 sps:$4 sm:$0xff]  }
   0x4   :  { %147 = vmatprep.subr.bf16.mxu0 %v685_v5  ;;  %188 = vmatprep.subr.bf16.mxu1 %v687_v6  ;;  %v693_v10 = vld [vmem:[%s922_s1 + $0x4c] ss:$16 sps:$4 sm:$0xff]   ;;  %v695_v11 = vld [vmem:[%s922_s1 + $0x40] ss:$16 sps:$4 sm:$0xff]   ;;  %v696_v12 = vld [vmem:[%s922_s1 + $0x48] ss:$16 sps:$4 sm:$0xff]  }
   0x5   :  { %v697_v13 = vld [vmem:[%s922_s1 + $0x64] ss:$16 sps:$4 sm:$0xff]   ;;  %v699_v14 = vld [vmem:[%s922_s1 + $0x6c] ss:$16 sps:$4 sm:$0xff]   ;;  %v701_v15 = vld [vmem:[%s922_s1 + $0x60] ss:$16 sps:$4 sm:$0xff]  }
   0x6   :  { %v702_v16 = vld [vmem:[%s922_s1 + $0x68] ss:$16 sps:$4 sm:$0xff]   ;;  %v21_v17 = vld [vmem:[%s923_s0] sm:$0xff]  ;;  %v711_v27 = vld [vmem:[%s924_s3 + $0x50] sm:$0xff]   ;;  %v42_v52 = vshrl.u32 %v41_v51, 7 }
   0x7   :  { %148 = vmatpush1.bf16.msra.mxu0 %v689_v7  ;;  %189 = vmatpush1.bf16.msra.mxu1 %v690_v8  ;;  %v703_v18 = vld [vmem:[%s924_s3 + $0x40] sm:$0xff]   ;;  %v22_v21 = vpack.c.bf16 %v21_v17, %v21_v17  ;;  %v707_v23 = vld [vmem:[%s924_s3 + $0x48] sm:$0xff]   ;;  %v712_v28 = vld [vmem:[%s924_s3 + $0xd0] sm:$0xff]  }
   0x8   :  { %149 = vmatprep.subr.bf16.mxu0 %v691_v9  ;;  %190 = vmatprep.subr.bf16.mxu1 %v693_v10  ;;  %v704_v19 = vld [vmem:[%s924_s3 + $0xc0] sm:$0xff]   ;;  %v708_v24 = vld [vmem:[%s924_s3 + $0xc8] sm:$0xff]   ;;  %v713_v29 = vld [vmem:[%s924_s3 + $0x10] sm:$0xff]   ;;  %v43_v53 = vsub.s32 0, %v42_v52  ;;  %v51_v54 = vsub.s32 2, %v42_v52  ;;  %v47_v56 = vsub.s32 1, %v42_v52 }
   0x9   :  { %v705_v20 = vld [vmem:[%s924_s3] sm:$0xff]   ;;  %v709_v25 = vld [vmem:[%s924_s3 + $0x8] sm:$0xff]   ;;  %v714_v30 = vld [vmem:[%s924_s3 + $0x90] sm:$0xff]   ;;  %v55_v57 = vsub.s32 3, %v42_v52 }
   0xa   :  { %v706_v22 = vld [vmem:[%s924_s3 + $0x80] sm:$0xff]   ;;  %v710_v26 = vld [vmem:[%s924_s3 + $0x88] sm:$0xff]   ;;  %v715_v31 = vld [vmem:[%s924_s3 + $0x58] sm:$0xff]  }
   0xb   :  { %150 = vmatpush1.bf16.msra.mxu0 %v695_v11  ;;  %191 = vmatpush1.bf16.msra.mxu1 %v696_v12  ;;  %v716_v32 = vld [vmem:[%s924_s3 + $0xd8] sm:$0xff]   ;;  %v719_v35 = vld [vmem:[%s924_s3 + $0x60] sm:$0xff]   ;;  %v723_v39 = vld [vmem:[%s924_s3 + $0x68] sm:$0xff]  }
   0xc   :  { %151 = vmatprep.subr.bf16.mxu0 %v697_v13  ;;  %192 = vmatprep.subr.bf16.mxu1 %v699_v14  ;;  %v717_v33 = vld [vmem:[%s924_s3 + $0x18] sm:$0xff]   ;;  %v720_v36 = vld [vmem:[%s924_s3 + $0xe0] sm:$0xff]   ;;  %v724_v40 = vld [vmem:[%s924_s3 + $0xe8] sm:$0xff]  }
   0xd   :  { %v718_v34 = vld [vmem:[%s924_s3 + $0x98] sm:$0xff]   ;;  %v721_v37 = vld [vmem:[%s924_s3 + $0x20] sm:$0xff]   ;;  %v725_v41 = vld [vmem:[%s924_s3 + $0x28] sm:$0xff]  }
   0xe   :  { %v722_v38 = vld [vmem:[%s924_s3 + $0xa0] sm:$0xff]   ;;  %v726_v42 = vld [vmem:[%s924_s3 + $0xa8] sm:$0xff]   ;;  %v727_v43 = vld [vmem:[%s924_s3 + $0x70] sm:$0xff]  }
   0xf   :  { %152 = vmatpush1.bf16.msra.mxu0 %v701_v15  ;;  %193 = vmatpush1.bf16.msra.mxu1 %v702_v16  ;;  %v728_v44 = vld [vmem:[%s924_s3 + $0xf0] sm:$0xff]   ;;  %v731_v47 = vld [vmem:[%s924_s3 + $0x78] sm:$0xff]   ;;  %v39_v55 = vld [vmem:[%s925_s2] sm:$0xf] }
  0x10   :  { %634 = vmatprep.subr.bf16.mxu0 %v703_v18  ;;  %656 = vmatprep.subr.bf16.mxu1 %v704_v19  ;;  %v729_v45 = vld [vmem:[%s924_s3 + $0x30] sm:$0xff]   ;;  %v732_v48 = vld [vmem:[%s924_s3 + $0xf8] sm:$0xff]   ;;  %v44_v58 = vrot.slane %v39_v55, %v43_v53  ;;  %v52_v59 = vrot.slane %v39_v55, %v51_v54  ;;  %v48_v60 = vrot.slane %v39_v55, %v47_v56 }
  0x11   :  { %v730_v46 = vld [vmem:[%s924_s3 + $0xb0] sm:$0xff]   ;;  %v733_v49 = vld [vmem:[%s924_s3 + $0x38] sm:$0xff]   ;;  %v56_v61 = vrot.slane %v39_v55, %v55_v57 }
  0x12   :  { %599 = vmatmul.mubr.msk.bf16.vlgmr.msra.gmra.mrb[0].mxu0 %vm141_vm0, %v22_v21  ;;  %600 = vmatmul.mubr.msk.bf16.vlgmr.msra.gmra.mrb[0].mxu1 %vm141_vm0, %v22_v21  ;;  %v734_v50 = vld [vmem:[%s924_s3 + $0xb8] sm:$0xff]  }
  0x13   :  { %635 = vmatpush3.bf16.msra.mxu0 %v705_v20  ;;  %657 = vmatpush3.bf16.msra.mxu1 %v706_v22  ;;  %v601_v20 = vld [vmem:[%s926_s4] ss:$0 sm:$0xff] }
  0x14   :  { %636 = vmatprep.subr.bf16.mxu0 %v707_v23  ;;  %658 = vmatprep.subr.bf16.mxu1 %v708_v24 }
  0x17   :  { %637 = vmatpush3.bf16.msra.mxu0 %v709_v25  ;;  %659 = vmatpush3.bf16.msra.mxu1 %v710_v26 }
  0x18   :  { %638 = vmatprep.subr.bf16.mxu0 %v711_v27  ;;  %660 = vmatprep.subr.bf16.mxu1 %v712_v28 }
  0x1b   :  { %639 = vmatpush3.bf16.msra.mxu0 %v713_v29  ;;  %661 = vmatpush3.bf16.msra.mxu1 %v714_v30 }
  0x1c   :  { %640 = vmatprep.subr.bf16.mxu0 %v715_v31  ;;  %662 = vmatprep.subr.bf16.mxu1 %v716_v32 }
  0x1f   :  { %641 = vmatpush3.bf16.msra.mxu0 %v717_v33  ;;  %663 = vmatpush3.bf16.msra.mxu1 %v718_v34 }
  0x20   :  { %642 = vmatprep.subr.bf16.mxu0 %v719_v35  ;;  %664 = vmatprep.subr.bf16.mxu1 %v720_v36 }
  0x23   :  { %643 = vmatpush3.bf16.msra.mxu0 %v721_v37  ;;  %665 = vmatpush3.bf16.msra.mxu1 %v722_v38 }
  0x24   :  { %644 = vmatprep.subr.bf16.mxu0 %v723_v39  ;;  %666 = vmatprep.subr.bf16.mxu1 %v724_v40 }
  0x27   :  { %645 = vmatpush3.bf16.msra.mxu0 %v725_v41  ;;  %667 = vmatpush3.bf16.msra.mxu1 %v726_v42 }
  0x28   :  { %646 = vmatprep.subr.bf16.mxu0 %v727_v43  ;;  %668 = vmatprep.subr.bf16.mxu1 %v728_v44 }
  0x2b   :  { %647 = vmatpush3.bf16.msra.mxu0 %v729_v45  ;;  %669 = vmatpush3.bf16.msra.mxu1 %v730_v46 }
  0x2c   :  { %648 = vmatprep.subr.bf16.mxu0 %v731_v47  ;;  %670 = vmatprep.subr.bf16.mxu1 %v732_v48 }
  0x2f   :  { %649 = vmatpush3.bf16.msra.mxu0 %v733_v49  ;;  %671 = vmatpush3.bf16.msra.mxu1 %v734_v50 }
  0xe5   :  { %v179_v62 = vpop.f32.mrb[0].mxu0  ;;  %v220_v63 = vpop.f32.mrb[0].mxu1 }
  0xe6   :  { %v180_v0 = vadd.f32 %v179_v62, %v44_v58  ;;  %v221_v1 = vadd.f32 %v220_v63, %v52_v59  ;;  %v181_v2 = vpop.f32.mrb[1].mxu0  ;;  %v222_v3 = vpop.f32.mrb[1].mxu1 }
  0xe7   :  { %v182_v4 = vadd.f32 %v181_v2, %v48_v60  ;;  %v223_v5 = vadd.f32 %v222_v3, %v56_v61  ;;  %v183_v6 = vpop.f32.mrb[2].mxu0  ;;  %v224_v7 = vpop.f32.mrb[2].mxu1 }
  0xe8   :  { %v227_v8 = vmax.f32 %v180_v0, 0.0  ;;  %v229_v9 = vmax.f32 %v221_v1, 0.0  ;;  %v184_v10 = vpop.f32.mrb[3].mxu0  ;;  %v225_v11 = vpop.f32.mrb[3].mxu1 }
  0xe9   :  { %v228_v12 = vmax.f32 %v182_v4, 0.0  ;;  %v230_v13 = vmax.f32 %v223_v5, 0.0 }
  0xea   :  { %v233_v14 = vpack.c.bf16 %v229_v9, %v229_v9  ;;  %v231_v17 = vpack.c.bf16 %v227_v8, %v227_v8 }
  0xeb   :  { %v232_v15 = vpack.c.bf16 %v228_v12, %v228_v12  ;;  %v234_v16 = vpack.c.bf16 %v230_v13, %v230_v13 }
  0xed   :  { %530 = vmatprep.mubr.bf16.mxu0 %v232_v15  ;;  %570 = vmatprep.mubr.bf16.mxu1 %v234_v16 }
  0xee   :  { %531 = vmatmul.mubr.bf16.vlgmr.msra.gmra.mrb[4].mxu0 %v231_v17  ;;  %571 = vmatmul.mubr.bf16.vlgmr.msra.gmra.mrb[4].mxu1 %v233_v14 }
 0x1c1   :  { %v650_v18 = vpop.f32.mrb[4].mxu0  ;;  %v672_v19 = vpop.f32.mrb[4].mxu1 }
 0x1c2   :  { %v651_v21 = vpop.f32.mrb[5].mxu0  ;;  %v673_v22 = vpop.f32.mrb[5].mxu1 }
 0x1c3   :  { %v652_v23 = vadd.f32 %v651_v21, %v650_v18  ;;  %v674_v24 = vadd.f32 %v673_v22, %v672_v19  ;;  %v653_v25 = vpop.f32.mrb[6].mxu0  ;;  %v675_v26 = vpop.f32.mrb[6].mxu1 }
 0x1c4   :  { %v654_v27 = vpop.f32.mrb[7].mxu0  ;;  %v676_v28 = vpop.f32.mrb[7].mxu1 }
 0x1c5   :  { %v533_v29 = vadd.f32 %v652_v23, %v601_v20 }
 0x1c7   :  { %v573_v30 = vadd.f32 %v674_v24, %v533_v29 }
 0x1c9   :  { %578 = vst [vmem:[%s927_s5] sm:$0xff] %v573_v30 }

</bundles_post_ra>
